<compile_context>
chip_gen: v7x
topology: tpu7x:2x2x1
jax: 0.10.0
libtpu: 0.0.40
codegen_flags: <defaults>
</compile_context>

<pallas_src>
import functools

import jax
import jax.numpy as jnp
from jax.experimental import pallas as pl
from jax.experimental.pallas import tpu as pltpu


# ---------------------------------------------------------------------------
# Kernel
# ---------------------------------------------------------------------------
def _vdn_critic_kernel(
    obs_ref,                 # [TB, input_dim]            (bf16 or f32)
    w1_ref, b1_ref,          # criticNet Linear(input_dim, hidden); bias f32
    wh_ref, bh_ref,          # fused VNet-1 | AdvNet-1: [hidden, 2*hidden]
    wo_ref, bo_ref,          # fused block-diag heads:   [2*hidden, 1+n_action]
    q_ref,                   # output: [TB, n_action]    (f32)
    *, n_action,
):
    compute_dtype = obs_ref.dtype
    obs = obs_ref[...]

    # criticNet: Linear + ReLU  (f32 accumulate, f32 bias/ReLU -> cast for MXU)
    h = jnp.dot(obs, w1_ref[...], preferred_element_type=jnp.float32) + b1_ref[...]
    h = jnp.maximum(h, 0.0).astype(compute_dtype)

    # Fused first layers of VNet & AdvNet (single MXU push) + ReLU.
    z = jnp.dot(h, wh_ref[...], preferred_element_type=jnp.float32) + bh_ref[...]
    z = jnp.maximum(z, 0.0).astype(compute_dtype)

    # Fused second layers: block-diagonal weight keeps the heads independent.
    # Column 0 is V, columns 1: are Adv.
    va = jnp.dot(z, wo_ref[...], preferred_element_type=jnp.float32) + bo_ref[...]

    v = va[:, 0:1]
    adv = va[:, 1:]
    # Dueling combination: Adv - mean(Adv) + V (static 1/n_action multiply;
    # the V column is excluded from the mean).  Cross-lane sum lands on XLU.
    adv = adv - jnp.sum(adv, axis=-1, keepdims=True) * (1.0 / n_action)
    q_ref[...] = (adv + v).astype(q_ref.dtype)


# ---------------------------------------------------------------------------
# Tiling / device helpers
# ---------------------------------------------------------------------------
def _round_up(x, m):
    return ((x + m - 1) // m) * m


def _tpu_generation():
    try:
        kind = jax.devices()[0].device_kind.lower()
    except Exception:
        kind = ""
    if "v7" in kind or "7x" in kind:
        return "v7x"
    if "v5e" in kind or "v5 lite" in kind or "v5lite" in kind:
        return "v5e"
    return "other"


def _tile_config(batch, gen):
    """Pick the batch tile and an explicit scoped-VMEM limit.

    VMEM per row is dominated by the 128-lane padding of the narrow blocks
    (~2.5-4 KB/row incl. double buffers + intermediates), so:
      v7x  (64 MiB physical, 32 MiB scoped default): cap tb at 4096 rows.
      v5e/v6e (128 MiB physical): cap tb at 8192 rows, raise the scoped limit
      explicitly (v5e's default is only 16 MiB).
    """
    cap = 4096 if gen == "v7x" else 8192
    vmem_limit = (40 << 20) if gen == "v7x" else (64 << 20)
    sub = 16  # sublane granule (covers bf16 16-row packing; fine for f32 too)
    if batch <= sub:
        tb = batch                       # single block == full array, no padding
    else:
        # >=2 grid steps whenever possible so "parallel" actually megacore-shards.
        tb = min(cap, _round_up(pl.cdiv(batch, 2), sub))
    return tb, vmem_limit


# ---------------------------------------------------------------------------
# Wrapper
# ---------------------------------------------------------------------------
def vdn_critic_forward(obs, params, *, use_bf16=True):
    """Dueling-critic forward pass as one gridded Pallas kernel.

    obs: [batch, input_dim] float32
    params: dict from `make_params`.
    """
    batch, input_dim = obs.shape
    hidden = params["w1"].shape[1]
    n_action = params["wa2"].shape[1]

    if use_bf16:
        w1, wh, wo = params["w1_lp"], params["wh_lp"], params["wo_lp"]
        obs_in = obs.astype(jnp.bfloat16)
    else:
        w1, wh, wo = params["w1"], params["wh_fused"], params["wo_fused"]
        obs_in = obs
    b1, bh, bo = params["b1"], params["bh_fused"], params["bo_fused"]

    gen = _tpu_generation()
    tb, vmem_limit = _tile_config(batch, gen)

    padded = pl.cdiv(batch, tb) * tb
    if padded != batch:
        # Only hit for ragged batches (pad < tb rows); nicely-sized batches
        # (as in the demo) take the no-copy path.
        obs_in = jnp.pad(obs_in, ((0, padded - batch), (0, 0)))

    grid = (padded // tb,)

    def batch_map(i):
        return (i, 0)

    def resident_map(i):
        # Same block every grid step -> weights/biases stay VMEM-resident.
        return (0, 0)

    kernel = functools.partial(_vdn_critic_kernel, n_action=n_action)

    flops = 2 * padded * (input_dim * hidden
                          + hidden * (2 * hidden)
                          + (2 * hidden) * (1 + n_action))
    weight_bytes = sum(int(p.size) * p.dtype.itemsize
                       for p in (w1, b1, wh, bh, wo, bo))
    bytes_accessed = (int(obs_in.size) * obs_in.dtype.itemsize
                      + padded * n_action * 4
                      + weight_bytes)

    q = pl.pallas_call(
        kernel,
        out_shape=jax.ShapeDtypeStruct((padded, n_action), jnp.float32),
        grid_spec=pltpu.PrefetchScalarGridSpec(
            num_scalar_prefetch=0,
            grid=grid,
            in_specs=[
                pl.BlockSpec((tb, input_dim), batch_map),
                pl.BlockSpec(w1.shape, resident_map),
                pl.BlockSpec(b1.shape, resident_map),
                pl.BlockSpec(wh.shape, resident_map),
                pl.BlockSpec(bh.shape, resident_map),
                pl.BlockSpec(wo.shape, resident_map),
                pl.BlockSpec(bo.shape, resident_map),
            ],
            out_specs=pl.BlockSpec((tb, n_action), batch_map),
        ),
        compiler_params=pltpu.CompilerParams(
            dimension_semantics=("parallel",),
            vmem_limit_bytes=vmem_limit),
        cost_estimate=pl.CostEstimate(
            flops=flops, transcendentals=0, bytes_accessed=bytes_accessed),
    )(obs_in, w1, b1, wh, bh, wo, bo)

    if padded != batch:
        q = q[:batch]
    return q


# ---------------------------------------------------------------------------
# Parameters (nn.Linear-compatible shapes, stored [in, out]) + fused heads
# ---------------------------------------------------------------------------
def make_params(key, input_dim, hidden, n_action):
    def linear(k, fan_in, fan_out):
        kw, kb = jax.random.split(k)
        bound = 1.0 / jnp.sqrt(jnp.float32(fan_in))
        w = jax.random.uniform(kw, (fan_in, fan_out), jnp.float32, -bound, bound)
        b = jax.random.uniform(kb, (1, fan_out), jnp.float32, -bound, bound)
        return w, b

    keys = jax.random.split(key, 5)
    w1, b1 = linear(keys[0], input_dim, hidden)
    wv1, bv1 = linear(keys[1], hidden, hidden)
    wv2, bv2 = linear(keys[2], hidden, 1)
    wa1, ba1 = linear(keys[3], hidden, hidden)
    wa2, ba2 = linear(keys[4], hidden, n_action)

    # Fused first-layer heads: [hidden, 2*hidden].
    wh_fused = jnp.concatenate([wv1, wa1], axis=1)
    bh_fused = jnp.concatenate([bv1, ba1], axis=1)

    # Fused second-layer heads (block diagonal keeps V / Adv independent):
    # column 0 = V, columns 1: = Adv.
    wo_fused = jnp.zeros((2 * hidden, 1 + n_action), jnp.float32)
    wo_fused = wo_fused.at[:hidden, 0:1].set(wv2)
    wo_fused = wo_fused.at[hidden:, 1:].set(wa2)
    bo_fused = jnp.concatenate([bv2, ba2], axis=1)

    return dict(
        w1=w1, b1=b1,
        wv1=wv1, bv1=bv1, wv2=wv2, bv2=bv2,
        wa1=wa1, ba1=ba1, wa2=wa2, ba2=ba2,
        wh_fused=wh_fused, bh_fused=bh_fused,
        wo_fused=wo_fused, bo_fused=bo_fused,
        # Low-precision copies for the kernel (biases stay f32).
        w1_lp=w1.astype(jnp.bfloat16),
        wh_lp=wh_fused.astype(jnp.bfloat16),
        wo_lp=wo_fused.astype(jnp.bfloat16),
    )


def vdn_critic_reference(obs, p):
    """Pure-JAX f32 reference matching the PyTorch module (unfused path)."""
    h = jnp.maximum(obs @ p["w1"] + p["b1"], 0.0)
    v = jnp.maximum(h @ p["wv1"] + p["bv1"], 0.0) @ p["wv2"] + p["bv2"]
    a = jnp.maximum(h @ p["wa1"] + p["ba1"], 0.0) @ p["wa2"] + p["ba2"]
    a = a - jnp.mean(a, axis=-1, keepdims=True)
    return a + v


if __name__ == "__main__":
    # Shapes consistent with the module:
    #   args.input_shape[agent]=16, args.critic_hidden=32, args.n_actions[agent]=8
    batch, input_dim, hidden, n_action = 8, 16, 32, 8

    key = jax.random.PRNGKey(0)
    k_obs, k_params, k_obs_big = jax.random.split(key, 3)

    params = make_params(k_params, input_dim, hidden, n_action)

    # Small batch (single grid step, no padding).
    obs = jax.random.normal(k_obs, (batch, input_dim), jnp.float32)
    q = jax.block_until_ready(vdn_critic_forward(obs, params))
    q_ref = vdn_critic_reference(obs, params)
    assert q.shape == (batch, n_action)
    # bf16 inputs + f32 accumulation -> loosened tolerance vs the f32 reference.
    assert jnp.allclose(q, q_ref, atol=5e-2, rtol=5e-2), "small-batch mismatch"

    # Larger batch exercises the multi-step grid (megacore sharding),
    # VMEM-resident weights across steps and the pipelined obs/q blocks.
    big = 4096
    obs_big = jax.random.normal(k_obs_big, (big, input_dim), jnp.float32)
    q_big = jax.block_until_ready(vdn_critic_forward(obs_big, params))
    q_big_ref = vdn_critic_reference(obs_big, params)
    assert q_big.shape == (big, n_action)
    assert jnp.allclose(q_big, q_big_ref, atol=5e-2, rtol=5e-2), "big-batch mismatch"

    print("KERNEL_OK")
</pallas_src>

<mosaic_0001>
module attributes {stable_mosaic.version = 11 : i64} {
  func.func @_vdn_critic_kernel(%arg0: i32, %arg1: memref<8x16xbf16, #tpu.memory_space<vmem>>, %arg2: memref<16x32xbf16, #tpu.memory_space<vmem>>, %arg3: memref<1x32xf32, #tpu.memory_space<vmem>>, %arg4: memref<32x64xbf16, #tpu.memory_space<vmem>>, %arg5: memref<1x64xf32, #tpu.memory_space<vmem>>, %arg6: memref<64x9xbf16, #tpu.memory_space<vmem>>, %arg7: memref<1x9xf32, #tpu.memory_space<vmem>>, %arg8: memref<8x8xf32, #tpu.memory_space<vmem>>) attributes {dimension_semantics = [#tpu.dimension_semantics<parallel>], iteration_bounds = array<i64: 1>, scalar_prefetch = 0 : i64, scratch_operands = 0 : i64, tpu.core_type = #tpu.core_type<tc>, window_params = [{transform_indices = @transform_0, window_bounds = array<i64: 8, 16>}, {pipeline_mode = #tpu.pipeline_mode<synchronous>, transform_indices = @transform_1, window_bounds = array<i64: 16, 32>}, {pipeline_mode = #tpu.pipeline_mode<synchronous>, transform_indices = @transform_2, window_bounds = array<i64: 1, 32>}, {pipeline_mode = #tpu.pipeline_mode<synchronous>, transform_indices = @transform_3, window_bounds = array<i64: 32, 64>}, {pipeline_mode = #tpu.pipeline_mode<synchronous>, transform_indices = @transform_4, window_bounds = array<i64: 1, 64>}, {pipeline_mode = #tpu.pipeline_mode<synchronous>, transform_indices = @transform_5, window_bounds = array<i64: 64, 9>}, {pipeline_mode = #tpu.pipeline_mode<synchronous>, transform_indices = @transform_6, window_bounds = array<i64: 1, 9>}, {transform_indices = @transform_7, window_bounds = array<i64: 8, 8>}]} {
    %c0 = arith.constant 0 : index
    %c0_0 = arith.constant 0 : index
    %0 = vector.load %arg1[%c0, %c0_0] : memref<8x16xbf16, #tpu.memory_space<vmem>>, vector<8x16xbf16>
    %c0_1 = arith.constant 0 : index
    %c0_2 = arith.constant 0 : index
    %1 = vector.load %arg2[%c0_1, %c0_2] : memref<16x32xbf16, #tpu.memory_space<vmem>>, vector<16x32xbf16>
    %cst = arith.constant dense<0.000000e+00> : vector<8x32xf32>
    %2 = tpu.matmul %0, %1, %cst {dimension_numbers = #tpu.dot_dimension_numbers<[1], [0], [0], [1], [0, 0, 1, 1], [], []>} : vector<8x16xbf16>, vector<16x32xbf16>, vector<8x32xf32> -> vector<8x32xf32>
    %c0_3 = arith.constant 0 : index
    %c0_4 = arith.constant 0 : index
    %3 = vector.load %arg3[%c0_3, %c0_4] : memref<1x32xf32, #tpu.memory_space<vmem>>, vector<1x32xf32>
    %4 = vector.broadcast %3 : vector<1x32xf32> to vector<8x32xf32>
    %5 = arith.addf %2, %4 : vector<8x32xf32>
    %cst_5 = arith.constant 0.000000e+00 : f32
    %6 = vector.broadcast %cst_5 : f32 to vector<8x32xf32>
    %7 = arith.maximumf %5, %6 : vector<8x32xf32>
    %8 = arith.truncf %7 : vector<8x32xf32> to vector<8x32xbf16>
    %c0_6 = arith.constant 0 : index
    %c0_7 = arith.constant 0 : index
    %9 = vector.load %arg4[%c0_6, %c0_7] : memref<32x64xbf16, #tpu.memory_space<vmem>>, vector<32x64xbf16>
    %cst_8 = arith.constant dense<0.000000e+00> : vector<8x64xf32>
    %10 = tpu.matmul %8, %9, %cst_8 {dimension_numbers = #tpu.dot_dimension_numbers<[1], [0], [0], [1], [0, 0, 1, 1], [], []>} : vector<8x32xbf16>, vector<32x64xbf16>, vector<8x64xf32> -> vector<8x64xf32>
    %c0_9 = arith.constant 0 : index
    %c0_10 = arith.constant 0 : index
    %11 = vector.load %arg5[%c0_9, %c0_10] : memref<1x64xf32, #tpu.memory_space<vmem>>, vector<1x64xf32>
    %12 = vector.broadcast %11 : vector<1x64xf32> to vector<8x64xf32>
    %13 = arith.addf %10, %12 : vector<8x64xf32>
    %cst_11 = arith.constant 0.000000e+00 : f32
    %14 = vector.broadcast %cst_11 : f32 to vector<8x64xf32>
    %15 = arith.maximumf %13, %14 : vector<8x64xf32>
    %16 = arith.truncf %15 : vector<8x64xf32> to vector<8x64xbf16>
    %c0_12 = arith.constant 0 : index
    %c0_13 = arith.constant 0 : index
    %17 = vector.load %arg6[%c0_12, %c0_13] : memref<64x9xbf16, #tpu.memory_space<vmem>>, vector<64x9xbf16>
    %cst_14 = arith.constant dense<0.000000e+00> : vector<8x9xf32>
    %18 = tpu.matmul %16, %17, %cst_14 {dimension_numbers = #tpu.dot_dimension_numbers<[1], [0], [0], [1], [0, 0, 1, 1], [], []>} : vector<8x64xbf16>, vector<64x9xbf16>, vector<8x9xf32> -> vector<8x9xf32>
    %c0_15 = arith.constant 0 : index
    %c0_16 = arith.constant 0 : index
    %19 = vector.load %arg7[%c0_15, %c0_16] : memref<1x9xf32, #tpu.memory_space<vmem>>, vector<1x9xf32>
    %20 = vector.broadcast %19 : vector<1x9xf32> to vector<8x9xf32>
    %21 = arith.addf %18, %20 : vector<8x9xf32>
    %22 = vector.extract_strided_slice %21 {offsets = [0, 0], sizes = [8, 1], strides = [1, 1]} : vector<8x9xf32> to vector<8x1xf32>
    %23 = vector.extract_strided_slice %21 {offsets = [0, 1], sizes = [8, 8], strides = [1, 1]} : vector<8x9xf32> to vector<8x8xf32>
    %cst_17 = arith.constant dense<0.000000e+00> : vector<8xf32>
    %24 = vector.multi_reduction <add>, %23, %cst_17 [1] : vector<8x8xf32> to vector<8xf32>
    %25 = vector.shape_cast %24 : vector<8xf32> to vector<8x1xf32>
    %cst_18 = arith.constant 1.250000e-01 : f32
    %26 = vector.broadcast %cst_18 : f32 to vector<8x1xf32>
    %27 = arith.mulf %25, %26 : vector<8x1xf32>
    %28 = vector.broadcast %27 : vector<8x1xf32> to vector<8x8xf32>
    %29 = arith.subf %23, %28 : vector<8x8xf32>
    %30 = vector.broadcast %22 : vector<8x1xf32> to vector<8x8xf32>
    %31 = arith.addf %29, %30 : vector<8x8xf32>
    %c0_19 = arith.constant 0 : index
    %c0_20 = arith.constant 0 : index
    %32 = vector.load %arg8[%c0_19, %c0_20] : memref<8x8xf32, #tpu.memory_space<vmem>>, vector<8x8xf32>
    tpu.vector_store %arg8[%c0_19, %c0_20], %31 {strides = array<i32>} : memref<8x8xf32, #tpu.memory_space<vmem>>, vector<8x8xf32>,
    return
  }
  func.func @transform_0(%arg0: i32) -> (i32, i32) {
    %c0_i32 = arith.constant 0 : i32
    %c0_i32_0 = arith.constant 0 : i32
    return %arg0, %c0_i32 : i32, i32
  }
  func.func @transform_1(%arg0: i32) -> (i32, i32) {
    %c0_i32 = arith.constant 0 : i32
    %c0_i32_0 = arith.constant 0 : i32
    %c0_i32_1 = arith.constant 0 : i32
    return %c0_i32, %c0_i32_0 : i32, i32
  }
  func.func @transform_2(%arg0: i32) -> (i32, i32) {
    %c0_i32 = arith.constant 0 : i32
    %c0_i32_0 = arith.constant 0 : i32
    %c0_i32_1 = arith.constant 0 : i32
    return %c0_i32, %c0_i32_0 : i32, i32
  }
  func.func @transform_3(%arg0: i32) -> (i32, i32) {
    %c0_i32 = arith.constant 0 : i32
    %c0_i32_0 = arith.constant 0 : i32
    %c0_i32_1 = arith.constant 0 : i32
    return %c0_i32, %c0_i32_0 : i32, i32
  }
  func.func @transform_4(%arg0: i32) -> (i32, i32) {
    %c0_i32 = arith.constant 0 : i32
    %c0_i32_0 = arith.constant 0 : i32
    %c0_i32_1 = arith.constant 0 : i32
    return %c0_i32, %c0_i32_0 : i32, i32
  }
  func.func @transform_5(%arg0: i32) -> (i32, i32) {
    %c0_i32 = arith.constant 0 : i32
    %c0_i32_0 = arith.constant 0 : i32
    %c0_i32_1 = arith.constant 0 : i32
    return %c0_i32, %c0_i32_0 : i32, i32
  }
  func.func @transform_6(%arg0: i32) -> (i32, i32) {
    %c0_i32 = arith.constant 0 : i32
    %c0_i32_0 = arith.constant 0 : i32
    %c0_i32_1 = arith.constant 0 : i32
    return %c0_i32, %c0_i32_0 : i32, i32
  }
  func.func @transform_7(%arg0: i32) -> (i32, i32) {
    %c0_i32 = arith.constant 0 : i32
    %c0_i32_0 = arith.constant 0 : i32
    return %arg0, %c0_i32 : i32, i32
  }
}

</mosaic_0001>

<bundles_post_ra>
// kernel: tpu_custom_call.1
= control target key start
LH: loop header
LB: loop body
LE: loop exit
PB: predicated region body
PF: predicated region fallthrough
CT: control target
= control target key end

     0   :  { %12 = vsyncpa [#allocation3], 0  ;;  %s784_s0 = inlined_call_operand.hbm [shape: bf16[8,16], index: 0, kind: input, shape index: {}]   ;;  %s785_s1 = inlined_call_operand.hbm [shape: bf16[16,32], index: 1, kind: input, shape index: {}]   ;;  %s786_s2 = inlined_call_operand.hbm [shape: f32[1,32], index: 2, kind: input, shape index: {}]   ;;  %s787_s3 = inlined_call_operand.hbm [shape: bf16[32,64], index: 3, kind: input, shape index: {}]   ;;  %s788_s4 = inlined_call_operand.hbm [shape: f32[1,64], index: 4, kind: input, shape index: {}]   ;;  %s789_s5 = inlined_call_operand.hbm [shape: bf16[64,9], index: 5, kind: input, shape index: {}]   ;;  %s790_s6 = inlined_call_operand.hbm [shape: f32[1,9], index: 6, kind: input, shape index: {}]   ;;  %s791_s7 = inlined_call_operand.hbm [shape: f32[8,8], index: 7, kind: output, shape index: {}]  }
   0x1   :  { %13 = vsyncpa [#allocation6], 0 }
   0x2   :  { %14 = vsyncpa [#allocation9], 0 }
   0x3   :  { %15 = vsyncpa [#allocation12], 0 }
   0x4   :  { %16 = vsyncpa [#allocation4], 0  ;;  %s625_s24 = smov [#allocation5]   ;;  %s439_s28 = scalar_lea.hbm %s785_s1, 128 }
   0x5   :  { %s32_s25 = sshll.u32 %s625_s24, 4  ;;  %p440_p0 = scmp.ne.s32.totalorder %s785_s1, %s439_s28  ;;  %s33_s25 = int_to_ptr.vmem [resolvable:$true] %s32_s25 }
   0x6   :  { %p443_p1 = scmp.lt.u32.totalorder %s439_s28, %s785_s1 }
   0x8   :  { %p445_p2 = pnand %p443_p1, %p440_p0 }
   0xa   :  { %448 = shalt.err (!%p445_p2)
}
   0xb   :  { %s449_s10 = scalar_lea.vmem %s33_s25, 128  ;;  %p454_p4 = scmp.lt.s32.totalorder %s33_s25, %s33_s25 }
   0xc   :  { %p450_p3 = scmp.ne.s32.totalorder %s33_s25, %s449_s10  ;;  %p455_p5 = scmp.lt.s32.totalorder %s449_s10, %s449_s10 }
   0xe   :  { %p456_p6 = por %p455_p5, %p454_p4 }
  0x10   :  { %p457_p7 = pnand %p456_p6, %p450_p3 }
  0x12   :  { %460 = shalt.err (!%p457_p7)
}
  0x13   :  { %s626_s11 = smov 64   ;;  %s627_s12 = smov 4  }
  0x14   :  { %38 = dma.hbm_to_vmem [thread:$0]  %s785_s1, 128, %s33_s25, [#allocation6], %s626_s11, %s626_s11, %s627_s12  }
  0x15   :  { %s628_s15 = smov [#allocation8]   ;;  %s629_s17 = smov [#allocation11]  }
  0x16   :  { %s54_s16 = sshll.u32 %s628_s15, 4  ;;  %s76_s18 = sshll.u32 %s629_s17, 4  ;;  %s55_s16 = int_to_ptr.vmem [resolvable:$true] %s54_s16  ;;  %s77_s18 = int_to_ptr.vmem [resolvable:$true] %s76_s18 }
  0x17   :  { %s461_s21 = scalar_lea.hbm %s787_s3, 256 }
  0x18   :  { %p462_p8 = scmp.ne.s32.totalorder %s787_s3, %s461_s21  ;;  %p465_p9 = scmp.lt.u32.totalorder %s461_s21, %s787_s3 }
  0x1a   :  { %p467_p10 = pnand %p465_p9, %p462_p8 }
  0x1c   :  { %470 = shalt.err (!%p467_p10)
}
  0x1d   :  { %s471_s1 = scalar_lea.vmem %s55_s16, 256  ;;  %p476_p12 = scmp.lt.s32.totalorder %s55_s16, %s55_s16 }
  0x1e   :  { %p472_p11 = scmp.ne.s32.totalorder %s55_s16, %s471_s1  ;;  %p477_p13 = scmp.lt.s32.totalorder %s471_s1, %s471_s1 }
  0x20   :  { %p478_p0 = por %p477_p13, %p476_p12 }
  0x22   :  { %p479_p1 = pnand %p478_p0, %p472_p11 }
  0x24   :  { %482 = shalt.err (!%p479_p1)
}
  0x25   :  { %60 = dma.hbm_to_vmem [thread:$0]  %s787_s3, 256, %s55_s16, [#allocation9], %s626_s11, %s626_s11, %s627_s12  }
  0x26   :  { %s483_s30 = scalar_lea.hbm %s789_s5, 512 }
  0x27   :  { %p484_p2 = scmp.ne.s32.totalorder %s789_s5, %s483_s30  ;;  %p487_p3 = scmp.lt.u32.totalorder %s483_s30, %s789_s5 }
  0x29   :  { %p489_p4 = pnand %p487_p3, %p484_p2 }
  0x2b   :  { %492 = shalt.err (!%p489_p4)
}
  0x2c   :  { %s493_s14 = scalar_lea.vmem %s77_s18, 512  ;;  %p498_p6 = scmp.lt.s32.totalorder %s77_s18, %s77_s18 }
  0x2d   :  { %p494_p5 = scmp.ne.s32.totalorder %s77_s18, %s493_s14  ;;  %p499_p7 = scmp.lt.s32.totalorder %s493_s14, %s493_s14 }
  0x2f   :  { %p500_p8 = por %p499_p7, %p498_p6 }
  0x31   :  { %p501_p9 = pnand %p500_p8, %p494_p5 }
  0x33   :  { %504 = shalt.err (!%p501_p9)
}
  0x34   :  { %82 = dma.hbm_to_vmem [thread:$0]  %s789_s5, 512, %s77_s18, [#allocation12], %s626_s11, %s626_s11, %s627_s12  }
  0x35   :  { %s630_s16 = smov [#allocation2]   ;;  %s631_s19 = smov [#allocation7]  }
  0x36   :  { %s23_s17 = sshll.u32 %s630_s16, 4  ;;  %s45_s20 = sshll.u32 %s631_s19, 4  ;;  %s24_s17 = int_to_ptr.vmem [resolvable:$true] %s23_s17  ;;  %s46_s20 = int_to_ptr.vmem [resolvable:$true] %s45_s20 }
  0x37   :  { %s505_s23 = scalar_lea.hbm %s784_s0, 64 }
  0x38   :  { %p506_p10 = scmp.ne.s32.totalorder %s784_s0, %s505_s23  ;;  %p509_p11 = scmp.lt.u32.totalorder %s505_s23, %s784_s0 }
  0x3a   :  { %p511_p12 = pnand %p509_p11, %p506_p10 }
  0x3c   :  { %514 = shalt.err (!%p511_p12)
}
  0x3d   :  { %s515_s5 = scalar_lea.vmem %s24_s17, 64  ;;  %p520_p0 = scmp.lt.s32.totalorder %s24_s17, %s24_s17 }
  0x3e   :  { %p516_p13 = scmp.ne.s32.totalorder %s24_s17, %s515_s5  ;;  %p521_p1 = scmp.lt.s32.totalorder %s515_s5, %s515_s5 }
  0x40   :  { %p522_p2 = por %p521_p1, %p520_p0 }
  0x42   :  { %p523_p3 = pnand %p522_p2, %p516_p13 }
  0x44   :  { %526 = shalt.err (!%p523_p3)
}
  0x45   :  { %26 = dma.hbm_to_vmem [thread:$0]  %s784_s0, 64, %s24_s17, [#allocation3]  }
  0x46   :  { %s527_s28 = scalar_lea.hbm %s786_s2, 16 }
  0x47   :  { %p528_p4 = scmp.ne.s32.totalorder %s786_s2, %s527_s28  ;;  %p531_p5 = scmp.lt.u32.totalorder %s527_s28, %s786_s2 }
  0x49   :  { %p533_p6 = pnand %p531_p5, %p528_p4 }
  0x4b   :  { %536 = shalt.err (!%p533_p6)
}
  0x4c   :  { %s537_s10 = scalar_lea.vmem %s46_s20, 16  ;;  %s541_s13 = scalar_lea.vmem %s46_s20, 32 }
  0x4d   :  { %p538_p7 = scmp.ne.s32.totalorder %s46_s20, %s537_s10  ;;  %p542_p8 = scmp.lt.s32.totalorder %s46_s20, %s46_s20 }
  0x4e   :  { %p543_p9 = scmp.lt.s32.totalorder %s541_s13, %s537_s10 }
  0x50   :  { %p544_p10 = por %p543_p9, %p542_p8 }
  0x52   :  { %p545_p11 = pnand %p544_p10, %p538_p7 }
  0x54   :  { %548 = shalt.err (!%p545_p11)
}
  0x55   :  { %48 = dma.hbm_to_vmem [thread:$0]  %s786_s2, 16, %s46_s20, [#allocation6]  }
  0x56   :  { %s632_s3 = smov [#allocation10]   ;;  %s633_s16 = smov [#allocation13]  }
  0x57   :  { %s67_s15 = sshll.u32 %s632_s3, 4  ;;  %s89_s17 = sshll.u32 %s633_s16, 4  ;;  %s68_s15 = int_to_ptr.vmem [resolvable:$true] %s67_s15  ;;  %s90_s17 = int_to_ptr.vmem [resolvable:$true] %s89_s17 }
  0x58   :  { %s549_s22 = scalar_lea.hbm %s788_s4, 16 }
  0x59   :  { %p550_p12 = scmp.ne.s32.totalorder %s788_s4, %s549_s22  ;;  %p553_p13 = scmp.lt.u32.totalorder %s549_s22, %s788_s4 }
  0x5b   :  { %p555_p0 = pnand %p553_p13, %p550_p12 }
  0x5d   :  { %558 = shalt.err (!%p555_p0)
}
  0x5e   :  { %s559_s2 = scalar_lea.vmem %s68_s15, 16  ;;  %s563_s20 = scalar_lea.vmem %s68_s15, 32 }
  0x5f   :  { %p560_p1 = scmp.ne.s32.totalorder %s68_s15, %s559_s2  ;;  %p564_p2 = scmp.lt.s32.totalorder %s68_s15, %s68_s15 }
  0x60   :  { %p565_p3 = scmp.lt.s32.totalorder %s563_s20, %s559_s2 }
  0x62   :  { %p566_p4 = por %p565_p3, %p564_p2 }
  0x64   :  { %p567_p5 = pnand %p566_p4, %p560_p1 }
  0x66   :  { %570 = shalt.err (!%p567_p5)
}
  0x67   :  { %70 = dma.hbm_to_vmem [thread:$0]  %s788_s4, 16, %s68_s15, [#allocation9]  }
  0x68   :  { %s571_s18 = scalar_lea.hbm %s790_s6, 16 }
  0x69   :  { %p572_p6 = scmp.ne.s32.totalorder %s790_s6, %s571_s18  ;;  %p575_p7 = scmp.lt.u32.totalorder %s571_s18, %s790_s6 }
  0x6b   :  { %p577_p8 = pnand %p575_p7, %p572_p6 }
  0x6d   :  { %580 = shalt.err (!%p577_p8)
}
  0x6e   :  { %s581_s8 = scalar_lea.vmem %s90_s17, 16  ;;  %s585_s9 = scalar_lea.vmem %s90_s17, 32 }
  0x6f   :  { %p582_p9 = scmp.ne.s32.totalorder %s90_s17, %s581_s8  ;;  %p586_p10 = scmp.lt.s32.totalorder %s90_s17, %s90_s17 }
  0x70   :  { %p587_p11 = scmp.lt.s32.totalorder %s585_s9, %s581_s8 }
  0x72   :  { %p588_p12 = por %p587_p11, %p586_p10 }
  0x74   :  { %p589_p13 = pnand %p588_p12, %p582_p9 }
  0x76   :  { %592 = shalt.err (!%p589_p13)
}
  0x77   :  { %92 = dma.hbm_to_vmem [thread:$0]  %s790_s6, 16, %s90_s17, [#allocation12]  }
  0x78   :  { %615 = dma.done.wait [#allocation3], 64  }
  0x79   :  { %616 = vsyncadd [#allocation3], 4294967232 }
  0x7a   :  { %617 = dma.done.wait [#allocation6], 144  }
  0x7b   :  { %618 = vsyncadd [#allocation6], 4294967152 }
  0x7c   :  { %619 = dma.done.wait [#allocation9], 272  }
  0x7d   :  { %620 = vsyncadd [#allocation9], 4294967024 }
  0x7e   :  { %621 = dma.done.wait [#allocation12], 528  }
  0x7f   :  { %622 = vsyncadd [#allocation12], 4294966768  ;;  %v634_v0 = vmov 0.0   ;;  %vm635_vm0 = vmmov 0   ;;  %v432_v1 = vld [vmem:[#allocation5] sm:$0xff]   ;;  %vm131_vm1 = vcmask 130048  }
  0x80   :  { %390 = vmatprep.subr.bf16.mxu1 %v634_v0  ;;  %392 = vmatprep.mubr.msk.bf16.mxu1 %vm635_vm0, %v634_v0  ;;  %v115_v2 = vld [vmem:[#allocation2] sm:$0xf]  ;;  %v433_v3 = vld [vmem:[#allocation8] sm:$0xff]   ;;  %v434_v4 = vld [vmem:[#allocation8 + $0x8] sm:$0xff]   ;;  %vm200_vm2 = vcmask 261120   ;;  %vm285_vm3 = vcmask 523264  }
  0x81   :  { %404 = vmatprep.subr.bf16.mxu0 %v634_v0  ;;  %412 = vmatprep.mubr.msk.bf16.mxu0 %vm635_vm0, %v634_v0  ;;  %v435_v5 = vld [vmem:[#allocation11] sm:$0xff]   ;;  %v436_v6 = vld [vmem:[#allocation11 + $0x8] sm:$0xff]   ;;  %v437_v15 = vld [vmem:[#allocation11 + $0x10] sm:$0xff]   ;;  %v636_v25 = vmov 0   ;;  %s637_s6 = smov 127   ;;  %vm333_vm4 = vcmask 64512  }
  0x82   :  { %391 = vmatpush3.bf16.msra.mxu1 %v432_v1  ;;  %405 = vmatpush3.bf16.msra.mxu0 %v435_v5  ;;  %v367_v7 = vld [vmem:[#allocation7] ss:$0 sm:$0xff]  ;;  %v438_v16 = vld [vmem:[#allocation11 + $0x18] sm:$0xff]   ;;  %v374_v26 = vld [vmem:[#allocation13] ss:$0 sm:$0xff]  ;;  %s638_s13 = smov [#allocation14]  }
  0x83   :  { %396 = vmatprep.subr.bf16.mxu1 %v634_v0  ;;  %406 = vmatprep.subr.bf16.mxu0 %v634_v0  ;;  %v370_v17 = vld [vmem:[#allocation10] ss:$0 sm:$0xff]  ;;  %s355_s0 = sshll.u32 %s638_s13, 4  ;;  %s356_s0 = int_to_ptr.vmem [resolvable:$true] %s355_s0 }
  0x84   :  { %430 = vset.pattern.permute.xlu1 %v636_v25  ;;  %431 = vset.pattern.permute.xlu0 %v636_v25  ;;  %s593_s14 = scalar_lea.vmem %s356_s0, 128  ;;  %p598_p1 = scmp.lt.s32.totalorder %s356_s0, %s356_s0 }
  0x85   :  { %393 = vmatmul.mubr.msk.bf16.vlgmr.msra.gmra.mrb[0].mxu1 %vm131_vm1, %v115_v2  ;;  %p594_p0 = scmp.ne.s32.totalorder %s356_s0, %s593_s14  ;;  %p599_p2 = scmp.lt.s32.totalorder %s593_s14, %s593_s14 }
  0x86   :  { %397 = vmatpush3.bf16.msra.mxu1 %v433_v3  ;;  %400 = vmatprep.mubr.msk.bf16.mxu1 %vm635_vm0, %v634_v0 }
  0x87   :  { %398 = vmatprep.subr.bf16.mxu1 %v634_v0  ;;  %407 = vmatpush3.bf16.msra.mxu0 %v436_v6  ;;  %p600_p3 = por %p599_p2, %p598_p1 }
  0x88   :  { %408 = vmatprep.subr.bf16.mxu0 %v634_v0 }
  0x89   :  { %p601_p4 = pnand %p600_p3, %p594_p0 }
  0x8a   :  { %399 = vmatpush3.bf16.msra.mxu1 %v434_v4 }
  0x8b   :  { %409 = vmatpush3.bf16.msra.mxu0 %v437_v15 }
  0x8c   :  { %410 = vmatprep.subr.bf16.mxu0 %v634_v0 }
  0x8f   :  { %411 = vmatpush3.bf16.msra.mxu0 %v438_v16 }
 0x158   :  { %v169_v8 = vpop.f32.mrb[0].mxu1 }
 0x159   :  { %v170_v9 = vadd.f32 %v367_v7, %v169_v8  ;;  %v394_v10 = vpop.f32.mrb[1].mxu1 }
 0x15a   :  { %v172_v11 = vpop.f32.mrb[2].mxu1 }
 0x15b   :  { %v175_v12 = vmax.f32 %v170_v9, 0.0  ;;  %v395_v13 = vpop.f32.mrb[3].mxu1 }
 0x15d   :  { %v176_v14 = vpack.c.bf16 %v175_v12, %v175_v12 }
 0x15f   :  { %401 = vmatmul.mubr.msk.bf16.vlgmr.msra.gmra.mrb[4].mxu1 %vm200_vm2, %v176_v14 }
 0x232   :  { %v238_v18 = vpop.f32.mrb[4].mxu1 }
 0x233   :  { %v239_v19 = vadd.f32 %v370_v17, %v238_v18  ;;  %v402_v20 = vpop.f32.mrb[5].mxu1 }
 0x234   :  { %v241_v21 = vpop.f32.mrb[6].mxu1 }
 0x235   :  { %v244_v22 = vmax.f32 %v239_v19, 0.0  ;;  %v403_v23 = vpop.f32.mrb[7].mxu1 }
 0x237   :  { %v245_v24 = vpack.c.bf16 %v244_v22, %v244_v22 }
 0x239   :  { %413 = vmatmul.mubr.msk.bf16.vlgmr.msra.gmra.mrb[0].mxu0 %vm285_vm3, %v245_v24 }
 0x30c   :  { %v323_v27 = vpop.f32.mrb[0].mxu0 }
 0x30d   :  { %v324_v28 = vadd.f32 %v374_v26, %v323_v27  ;;  %v414_v29 = vpop.f32.mrb[1].mxu0 }
 0x30e   :  { %v326_v30 = vpop.f32.mrb[2].mxu0 }
 0x30f   :  { %340 = vperm.xlu1 %430, %v324_v28   ;;  %330 = vrot.lane.b32.xlu0 %v324_v28, %s637_s6  ;;  %v415_v31 = vpop.f32.mrb[3].mxu0 }
 0x381   :  { %v331_v32 = vpop.permute.xlu0 %330 }
 0x382   :  { %v334_v33 = vsel %vm333_vm4, %v331_v32, 0.0 }
 0x383   :  { %335 = vadd.xlane.f32.xlu0 %v334_v33 }
 0x38e   :  { %v341_v37 = vpop.permute.xlu1 %340 }
 0x410   :  { %v336_v34 = vpop.xlane.xlu0 %335 }
 0x411   :  { %v337_v35 = vmul.f32 0.125, %v336_v34 }
 0x413   :  { %v338_v36 = vsub.f32 %v324_v28, %v337_v35 }
 0x415   :  { %v343_v38 = vadd.f32 %v341_v37, %v338_v36 }
 0x417   :  { %345 = vrot.lane.b32.xlu1 %v343_v38, %s637_s6 }
 0x489   :  { %v346_v39 = vpop.permute.xlu1 %345 }
 0x48a   :  { %348 = vst.msk [vmem:[#allocation14] sm:$0xff] %vm333_vm4, %v346_v39 }
 0x48b   :  { %604 = shalt.err (!%p601_p4)
}
 0x48c   :  { %s605_s16 = scalar_lea.hbm %s791_s7, 128 }
 0x48d   :  { %p606_p5 = scmp.ne.s32.totalorder %s791_s7, %s605_s16  ;;  %p609_p6 = scmp.lt.u32.totalorder %s605_s16, %s791_s7 }
 0x48f   :  { %p611_p7 = pnand %p609_p6, %p606_p5 }
 0x491   :  { %614 = shalt.err (!%p611_p7)
}
 0x492   :  { %358 = dma.vmem_to_hbm [thread:$0]  %s356_s0, 128, %s791_s7, [#allocation4]  }
 0x493   :  { %623 = dma.done.wait [#allocation4], 128  }
 0x494   :  { %624 = vsyncadd [#allocation4], 4294967168 }
 0x495   :  { %362 = vsyncpa [#allocation3], 1 }
 0x496   :  { %363 = vsyncpa [#allocation6], 1 }
 0x497   :  { %364 = vsyncpa [#allocation9], 1 }
 0x498   :  { %365 = vsyncpa [#allocation12], 1 }
 0x499   :  { %366 = vsyncpa [#allocation4], 1 }

</bundles_post_ra>
